<compile_context>
chip_gen: v6e
topology: v6e:2x2x1
jax: 0.10.0
libtpu: 0.0.40
codegen_flags: <defaults>
</compile_context>

<pallas_src>
import functools

import jax
import jax.numpy as jnp
from jax.experimental import pallas as pl
from jax.experimental.pallas import tpu as pltpu


def _round_up(x, m):
    return (x + m - 1) // m * m


# ----------------------------- Pallas kernel --------------------------------
def _linear_kernel(z_ref, w_ref, b_ref, out_ref):
    # z_ref  : (B,  Dp)  bf16, contraction axis zero-padded to 128-multiple
    # w_ref  : (Dp, Np)  bf16, pre-transposed weight (output lane-dense)
    # b_ref  : (1,  Np)  f32 bias row
    # out_ref: (B,  Np)  f32
    out_ref[...] = (
        jnp.dot(z_ref[...], w_ref[...], preferred_element_type=jnp.float32)
        + b_ref[...]
    )


# --------------------------- one-time param prep -----------------------------
def prepare_params(weight, bias, compute_dtype=jnp.bfloat16):
    """Init-time preparation of nn.Linear parameters.

    weight : (output_dim, input_dim)   torch nn.Linear layout
    bias   : (output_dim,)
    Returns (wT_padded (Dp, Np) bf16, bias_padded (1, Np) f32).
    Call once and cache; NOT part of the per-forward hot path.
    """
    n_out, d_in = weight.shape
    Dp = _round_up(max(d_in, 128), 128)
    Np = _round_up(max(n_out, 128), 128)
    wT_padded = jnp.pad(weight.T.astype(compute_dtype),
                        ((0, Dp - d_in), (0, Np - n_out)))
    bias_padded = jnp.pad(bias.astype(jnp.float32)[None, :],
                          ((0, 0), (0, Np - n_out)))
    return wT_padded, bias_padded


# ------------------------------- forward pass --------------------------------
@functools.partial(jax.jit, static_argnames=("n_out",))
def graph_input_processor_forward(z, wT_padded, bias_padded, *, n_out):
    """Equivalent of GraphInputProcessor.forward.

    z           : (B, input_dim) float32 feature embeddings
    wT_padded   : (Dp, Np) bf16   from prepare_params (cached)
    bias_padded : (1,  Np) f32    from prepare_params (cached)
    returns     : (B, n_out, 1) float32
    """
    B, d_in = z.shape
    Dp, Np = wT_padded.shape

    # Only the contraction axis needs zero-fill for correctness; single
    # fusible pad, no batch padding (whole-array block handles B=2 fine).
    zp = jnp.pad(z.astype(wT_padded.dtype), ((0, 0), (0, Dp - d_in)))

    out = pl.pallas_call(
        _linear_kernel,
        out_shape=jax.ShapeDtypeStruct((B, Np), jnp.float32),
        in_specs=[
            pl.BlockSpec(memory_space=pltpu.MemorySpace.VMEM),
            pl.BlockSpec(memory_space=pltpu.MemorySpace.VMEM),
            pl.BlockSpec(memory_space=pltpu.MemorySpace.VMEM),
        ],
        out_specs=pl.BlockSpec(memory_space=pltpu.MemorySpace.VMEM),
        cost_estimate=pl.CostEstimate(
            flops=2 * B * Dp * Np,
            bytes_accessed=(B * Dp + Dp * Np) * 2 + Np * 4 + B * Np * 4,
            transcendentals=0,
        ),
    )(zp, wT_padded, bias_padded)

    # Slice off lane padding and do the unsqueeze(-1) as metadata-only ops
    # (fused under jit with the pallas_call epilogue).
    return out[:, :n_out][..., None]


# ------------------------------ pure-JAX reference ---------------------------
def reference_forward(z, weight, bias):
    return (z @ weight.T + bias)[..., None]


# ----------------------------------- test ------------------------------------
if __name__ == "__main__":
    key = jax.random.PRNGKey(0)
    k1, k2, k3, k4, k5, k6 = jax.random.split(key, 6)

    # Shapes consistent with the module's use in the BIOGAN generator:
    # input_dim = latent + numerical + embedded categoricals = 27,
    # output_dim = n_nodes (genes) = 32, batch = 2.
    B, DIN, N = 2, 27, 32
    z = jax.random.normal(k1, (B, DIN), jnp.float32)
    weight = 0.1 * jax.random.normal(k2, (N, DIN), jnp.float32)
    bias = 0.1 * jax.random.normal(k3, (N,), jnp.float32)

    wT_p, b_p = prepare_params(weight, bias)          # init-time, cached
    out = jax.block_until_ready(
        graph_input_processor_forward(z, wT_p, b_p, n_out=N))
    ref = jax.block_until_ready(reference_forward(z, weight, bias))

    assert out.shape == (B, N, 1), out.shape
    # bf16 operands / f32 accumulate vs f32 reference -> loose-ish tolerance.
    assert jnp.allclose(out, ref, atol=3e-2, rtol=3e-2), (
        float(jnp.max(jnp.abs(out - ref))))

    # Larger, non-aligned case to exercise the padding path.
    B2, DIN2, N2 = 16, 200, 300
    z2 = jax.random.normal(k4, (B2, DIN2), jnp.float32)
    w2 = 0.05 * jax.random.normal(k5, (N2, DIN2), jnp.float32)
    b2 = 0.05 * jax.random.normal(k6, (N2,), jnp.float32)

    wT2_p, b2_p = prepare_params(w2, b2)
    out2 = jax.block_until_ready(
        graph_input_processor_forward(z2, wT2_p, b2_p, n_out=N2))
    ref2 = jax.block_until_ready(reference_forward(z2, w2, b2))

    assert out2.shape == (B2, N2, 1), out2.shape
    assert jnp.allclose(out2, ref2, atol=5e-2, rtol=5e-2), (
        float(jnp.max(jnp.abs(out2 - ref2))))

    print("KERNEL_OK")
</pallas_src>

<mosaic_0001>
module attributes {stable_mosaic.version = 11 : i64} {
  func.func @_linear_kernel(%arg0: memref<2x128xbf16, #tpu.memory_space<vmem>>, %arg1: memref<128x128xbf16, #tpu.memory_space<vmem>>, %arg2: memref<1x128xf32, #tpu.memory_space<vmem>>, %arg3: memref<2x128xf32, #tpu.memory_space<vmem>>) attributes {dimension_semantics = [], scalar_prefetch = 0 : i64, scratch_operands = 0 : i64, tpu.core_type = #tpu.core_type<tc>} {
    %c0 = arith.constant 0 : index
    %c0_0 = arith.constant 0 : index
    %0 = vector.load %arg0[%c0, %c0_0] : memref<2x128xbf16, #tpu.memory_space<vmem>>, vector<2x128xbf16>
    %c0_1 = arith.constant 0 : index
    %c0_2 = arith.constant 0 : index
    %1 = vector.load %arg1[%c0_1, %c0_2] : memref<128x128xbf16, #tpu.memory_space<vmem>>, vector<128x128xbf16>
    %cst = arith.constant dense<0.000000e+00> : vector<2x128xf32>
    %2 = tpu.matmul %0, %1, %cst {dimension_numbers = #tpu.dot_dimension_numbers<[1], [0], [0], [1], [0, 0, 1, 1], [], []>} : vector<2x128xbf16>, vector<128x128xbf16>, vector<2x128xf32> -> vector<2x128xf32>
    %c0_3 = arith.constant 0 : index
    %c0_4 = arith.constant 0 : index
    %3 = vector.load %arg2[%c0_3, %c0_4] : memref<1x128xf32, #tpu.memory_space<vmem>>, vector<1x128xf32>
    %4 = vector.broadcast %3 : vector<1x128xf32> to vector<2x128xf32>
    %5 = arith.addf %2, %4 : vector<2x128xf32>
    %c0_5 = arith.constant 0 : index
    %c0_6 = arith.constant 0 : index
    %6 = vector.load %arg3[%c0_5, %c0_6] : memref<2x128xf32, #tpu.memory_space<vmem>>, vector<2x128xf32>
    tpu.vector_store %arg3[%c0_5, %c0_6], %5 {strides = array<i32>} : memref<2x128xf32, #tpu.memory_space<vmem>>, vector<2x128xf32>,
    return
  }
}

</mosaic_0001>

<bundles_post_ra>
// kernel: graph_input_processor_forward.1
= control target key start
LH: loop header
LB: loop body
LE: loop exit
PB: predicated region body
PF: predicated region fallthrough
CT: control target
= control target key end

     0   :  { %8 = vsyncpa [#allocation3], 0  ;;  %s292_s0 = inlined_call_operand.vmem [shape: bf16[2,128], index: 0, kind: input, shape index: {}]   ;;  %s293_s1 = inlined_call_operand.hbm [shape: bf16[128,128], index: 1, kind: input, shape index: {}]   ;;  %s294_s2 = inlined_call_operand.vmem [shape: f32[1,128], index: 2, kind: input, shape index: {}]   ;;  %s295_s3 = inlined_call_operand.hbm [shape: f32[2,128], index: 3, kind: output, shape index: {}]  }
   0x1   :  { %9 = vsyncpa [#allocation4], 0  ;;  %s254_s12 = smov [#allocation2]  }
   0x2   :  { %s17_s13 = sshll.u32 %s254_s12, 4  ;;  %s18_s13 = int_to_ptr.vmem [resolvable:$true] %s17_s13 }
   0x3   :  { %s218_s14 = scalar_lea.vmem %s18_s13, 1024  ;;  %p223_p1 = scmp.lt.s32.totalorder %s18_s13, %s18_s13 }
   0x4   :  { %p219_p0 = scmp.ne.s32.totalorder %s18_s13, %s218_s14  ;;  %p224_p2 = scmp.lt.s32.totalorder %s218_s14, %s218_s14 }
   0x6   :  { %p225_p3 = por %p224_p2, %p223_p1 }
   0x8   :  { %p226_p4 = pnand %p225_p3, %p219_p0 }
   0xa   :  { %229 = shalt.err (!%p226_p4)
}
   0xb   :  { %s255_s15 = smov 64   ;;  %s256_s16 = smov 4  }
   0xc   :  { %23 = dma.hbm_to_vmem [thread:$0]  %s293_s1, 1024, %s18_s13, [#allocation3], %s255_s15, %s255_s15, %s256_s16  }
   0xd   :  { %250 = dma.done.wait [#allocation3], 1024  }
   0xe   :  { %251 = vsyncadd [#allocation3], 4294966272  ;;  %v257_v0 = vmov 0.0   ;;  %vm258_vm0 = vmmov 0   ;;  %v202_v1 = vld [vmem:[#allocation2 + $0x38] sm:$0xff]   ;;  %v203_v2 = vld [vmem:[#allocation2 + $0x30] sm:$0xff]  }
   0xf   :  { %176 = vmatprep.subr.bf16.mxu0 %v257_v0  ;;  %192 = vmatprep.mubr.msk.bf16.mxu0 %vm258_vm0, %v257_v0  ;;  %v204_v3 = vld [vmem:[#allocation2 + $0x28] sm:$0xff]   ;;  %v205_v4 = vld [vmem:[#allocation2 + $0x20] sm:$0xff]   ;;  %v206_v5 = vld [vmem:[#allocation2 + $0x18] sm:$0xff]   ;;  %s259_s22 = smov [#allocation5]  }
  0x10   :  { %177 = vmatpush3.bf16.msra.mxu0 %v202_v1  ;;  %v207_v6 = vld [vmem:[#allocation2 + $0x10] sm:$0xff]   ;;  %v208_v7 = vld [vmem:[#allocation2 + $0x8] sm:$0xff]   ;;  %v209_v8 = vld [vmem:[#allocation2] sm:$0xff]   ;;  %s149_s23 = sshll.u32 %s259_s22, 4  ;;  %s150_s23 = int_to_ptr.vmem [resolvable:$true] %s149_s23 }
  0x11   :  { %178 = vmatprep.subr.bf16.mxu0 %v257_v0  ;;  %v30_v9 = vld [vmem:[%s292_s0] sm:$0x1]  ;;  %s230_s24 = scalar_lea.vmem %s150_s23, 32  ;;  %p235_p6 = scmp.lt.s32.totalorder %s150_s23, %s150_s23 }
  0x12   :  { %v158_v10 = vld [vmem:[%s294_s2] ss:$0 sm:$0xff]  ;;  %p231_p5 = scmp.ne.s32.totalorder %s150_s23, %s230_s24  ;;  %p236_p7 = scmp.lt.s32.totalorder %s230_s24, %s230_s24 }
  0x14   :  { %179 = vmatpush3.bf16.msra.mxu0 %v203_v2  ;;  %p237_p8 = por %p236_p7, %p235_p6 }
  0x15   :  { %180 = vmatprep.subr.bf16.mxu0 %v257_v0 }
  0x16   :  { %p238_p9 = pnand %p237_p8, %p231_p5 }
  0x18   :  { %181 = vmatpush3.bf16.msra.mxu0 %v204_v3 }
  0x19   :  { %182 = vmatprep.subr.bf16.mxu0 %v257_v0 }
  0x1c   :  { %183 = vmatpush3.bf16.msra.mxu0 %v205_v4 }
  0x1d   :  { %184 = vmatprep.subr.bf16.mxu0 %v257_v0 }
  0x20   :  { %185 = vmatpush3.bf16.msra.mxu0 %v206_v5 }
  0x21   :  { %186 = vmatprep.subr.bf16.mxu0 %v257_v0 }
  0x24   :  { %187 = vmatpush3.bf16.msra.mxu0 %v207_v6 }
  0x25   :  { %188 = vmatprep.subr.bf16.mxu0 %v257_v0 }
  0x28   :  { %189 = vmatpush3.bf16.msra.mxu0 %v208_v7 }
  0x29   :  { %190 = vmatprep.subr.bf16.mxu0 %v257_v0 }
  0x2c   :  { %191 = vmatpush3.bf16.msra.mxu0 %v209_v8 }
  0x2f   :  { %193 = vmatmul.mubr.bf16.vlgmr.msra.gmra.mxu0 %v30_v9 }
  0xef   :  { %v136_v11 = vpop.f32.mrf.mxu0 }
  0xf0   :  { %v137_v12 = vadd.f32 %v158_v10, %v136_v11 }
  0xf1   :  { %v194_v13 = vpop.f32.mrf.mxu0 }
  0xf2   :  { %142 = vst [vmem:[#allocation5] sm:$0x3] %v137_v12 }
  0xf3   :  { %v139_v14 = vpop.f32.mrf.mxu0 }
  0xf4   :  { %241 = shalt.err (!%p238_p9)
}
  0xf5   :  { %152 = dma.vmem_to_hbm [thread:$0]  %s150_s23, 32, %s295_s3, [#allocation4]   ;;  %v195_v15 = vpop.f32.mrf.mxu0 }
  0xf6   :  { %252 = dma.done.wait [#allocation4], 32  }
  0xf7   :  { %253 = vsyncadd [#allocation4], 4294967264 }
  0xf8   :  { %156 = vsyncpa [#allocation3], 1 }
  0xf9   :  { %157 = vsyncpa [#allocation4], 1 }

</bundles_post_ra>
